<compile_context>
chip_gen: v6e
topology: v6e:2x2x1
jax: 0.10.0
libtpu: 0.0.40
codegen_flags: <defaults>
</compile_context>

<pallas_src>
import functools

import jax
import jax.numpy as jnp
import numpy as np
from jax import lax
from jax.experimental import pallas as pl
from jax.experimental.pallas import tpu as pltpu


def _cdiv(a, b):
    return -(-a // b)


def _round_up(a, b):
    return _cdiv(a, b) * b


# ----------------------------------------------------------------------------
# Fused Pallas kernel: embedding gather + jagged->padded dense, one matmul/tile
# ----------------------------------------------------------------------------
def _fused_seq_kernel(sel_ref, table_ref, out_ref):
    # sel_ref   : VMEM [T, 2] int32   -- col 0: item id in [0,V) or -1
    #                                    col 1: V_pad + price row in [V_pad,V_pad+P) or -1
    # table_ref : VMEM [K, D_total]   -- block-diagonal combined table (zero padded)
    # out_ref   : VMEM [T, D_total]   -- concatenated sequence output rows
    rows = sel_ref.shape[0]
    k = table_ref.shape[0]

    sel = sel_ref[...]                                   # [T, 2]
    item_sel = sel[:, 0:1]                               # [T, 1]
    price_sel = sel[:, 1:2]                              # [T, 1]

    # Single shared iota, two compares, one "two-hot" selector.  -1 never matches
    # -> all-zero row -> zero padding; item/price index ranges are disjoint.
    lanes = lax.broadcasted_iota(jnp.int32, (rows, k), 1)
    twohot = ((lanes == item_sel) | (lanes == price_sel)).astype(table_ref.dtype)

    # One MXU matmul, one full-block store (no masked lane sub-range stores).
    out_ref[...] = jnp.dot(
        twohot, table_ref[...], preferred_element_type=jnp.float32
    ).astype(out_ref.dtype)


def _offsets_from_lengths(lengths):
    lengths = lengths.astype(jnp.int32)
    return (jnp.cumsum(lengths) - lengths).astype(jnp.int32)


def _choose_rows_tile(rows, requested):
    """Largest tile <= requested (multiple of 8) that still yields >= 2 grid steps."""
    requested = max(8, (int(requested) // 8) * 8)
    if rows <= 8:
        return 8
    half = _round_up(_cdiv(rows, 2), 8)
    return max(8, min(requested, half))


@functools.partial(jax.jit, static_argnames=("max_seq_len", "rows_tile"))
def _sequence_group_forward(item_table, item_vals, item_lens,
                            price_vals, price_lens, *, max_seq_len, rows_tile=256):
    """Fused sequence-group forward: returns [B, max_seq_len, D_item + D_price]."""
    B = item_lens.shape[0]
    L = int(max_seq_len)
    V, d_item = item_table.shape
    P, d_price = price_vals.shape
    d_total = d_item + d_price

    # ---- block-diagonal combined table, contraction dim padded to 128 ----
    v_pad = _round_up(max(V, 1), 128)
    p_pad = _round_up(max(P, 1), 128)
    K = v_pad + p_pad
    table = jnp.zeros((K, d_total), jnp.float32)
    if V > 0:
        table = table.at[:V, :d_item].set(item_table.astype(jnp.float32))
    if P > 0:
        table = table.at[v_pad:v_pad + P, d_item:].set(price_vals.astype(jnp.float32))

    l_idx = jnp.arange(L, dtype=jnp.int32)[None, :]                   # [1, L]

    # ---- sparse sequence feature: item ids per (b, l), -1 where invalid ----
    item_off = _offsets_from_lengths(item_lens)                       # [B]
    item_pos = item_off[:, None] + l_idx                              # [B, L]
    item_valid = l_idx < item_lens[:, None].astype(jnp.int32)
    if item_vals.shape[0] > 0:
        item_pos_c = jnp.clip(item_pos, 0, item_vals.shape[0] - 1)
        ids = jnp.take(item_vals, item_pos_c).astype(jnp.int32)       # [B, L]
    else:
        ids = jnp.zeros((B, L), jnp.int32)
    # Mask invalid AND out-of-range ids (out-of-range would otherwise alias into the
    # price rows of the combined table; torch would raise, we silently zero).
    ids = jnp.where(item_valid & (ids >= 0) & (ids < V), ids, jnp.int32(-1))

    # ---- dense jagged sequence feature: shifted flat positions, -1 where invalid ----
    price_off = _offsets_from_lengths(price_lens)
    price_pos = price_off[:, None] + l_idx
    price_valid = l_idx < price_lens[:, None].astype(jnp.int32)
    price_sel = jnp.where(price_valid, price_pos + jnp.int32(v_pad), jnp.int32(-1))

    # ---- pack selectors, pad row count to a multiple of the row tile ----
    rows = B * L
    sel = jnp.stack([ids.reshape(-1), price_sel.reshape(-1)], axis=1)  # [rows, 2]

    rows_tile_eff = _choose_rows_tile(rows, rows_tile)
    n_tiles = _cdiv(rows, rows_tile_eff)
    rows_padded = n_tiles * rows_tile_eff
    sel = jnp.pad(sel, ((0, rows_padded - rows), (0, 0)), constant_values=-1)

    # ---- explicit VMEM budget (v7x: 64 MiB physical / 32 MiB scoped default) ----
    table_bytes = K * d_total * 4
    tile_bytes = rows_tile_eff * (d_total + 2) * 4          # out block + sel block
    twohot_bytes = rows_tile_eff * K * 4
    est = 2 * table_bytes + 2 * 2 * tile_bytes + 2 * twohot_bytes
    vmem_limit = int(min(64 << 20, max(16 << 20, 4 * est)))

    out = pl.pallas_call(
        _fused_seq_kernel,
        out_shape=jax.ShapeDtypeStruct((rows_padded, d_total), jnp.float32),
        grid_spec=pltpu.PrefetchScalarGridSpec(
            num_scalar_prefetch=0,
            grid=(n_tiles,),
            in_specs=[
                pl.BlockSpec((rows_tile_eff, 2), lambda i: (i, 0)),
                # Combined table: constant block index -> fetched once, VMEM resident.
                pl.BlockSpec((K, d_total), lambda i: (0, 0)),
            ],
            out_specs=pl.BlockSpec((rows_tile_eff, d_total), lambda i: (i, 0)),
        ),
        compiler_params=pltpu.CompilerParams(
            dimension_semantics=("parallel",),     # v7x: shard row tiles across 2 TCs
            vmem_limit_bytes=vmem_limit,
        ),
    )(sel, table)

    return out[:rows].reshape(B, L, d_total)


def _query_sparse_lookup(table, vals, lens):
    """to_padded_dense(1).squeeze(1): first id per sample, zeros if length==0.

    Deliberately plain XLA (per perf review): a dedicated pallas_call for a
    B x 32 gather is pure kernel-launch overhead.
    """
    B = lens.shape[0]
    if vals.shape[0] == 0:
        return jnp.zeros((B, table.shape[1]), table.dtype)
    off = _offsets_from_lengths(lens)
    first = jnp.clip(off, 0, vals.shape[0] - 1)
    ids = jnp.take(vals, first).astype(jnp.int32)
    emb = jnp.take(table, ids, axis=0)
    return jnp.where((lens > 0)[:, None], emb, jnp.zeros_like(emb))


# ----------------------------------------------------------------------------
# Module
# ----------------------------------------------------------------------------
class SequenceEmbeddingGroup:
    """JAX/Pallas re-implementation of SequenceEmbeddingGroupImpl for one group.

    Group "click":
      query features   : user_id (sparse, emb 50x32), user_age (dense, dim 8)
      sequence features: click_item_id (sparse, emb 100x32),
                         click_price   (dense jagged, dim 16)
    """

    def __init__(self, key):
        k1, k2 = jax.random.split(key)
        # Deterministic synthetic embedding tables (EmbeddingCollection weights).
        # Kept f32 so the numeric check against the f32 reference is tight; at
        # production scale store bf16 (0/1 selector stays exact; MXU is bf16-native
        # on v6e/v7x) if downstream tolerates it.
        self.user_id_table = jax.random.normal(k1, (50, 32), jnp.float32) * 0.05
        self.item_id_table = jax.random.normal(k2, (100, 32), jnp.float32) * 0.05
        self._group_output_dims = {
            "click.query": [32, 8],
            "click.sequence": [32, 16],
        }
        self._group_total_dim = {"click.query": 40, "click.sequence": 48}

    def group_dims(self, name):
        return self._group_output_dims[name]

    def group_total_dim(self, name):
        return self._group_total_dim[name]

    def all_group_total_dim(self):
        return self._group_total_dim

    def has_group(self, name):
        true = name.split(".")[0]
        return (true + ".query" in self._group_output_dims
                and true + ".sequence" in self._group_output_dims)

    def forward(self, sparse_feature, dense_feature, sequence_dense_features,
                max_seq_length=None):
        results = {}

        # ------------------ query part ------------------
        uid_vals, uid_lens = sparse_feature["user_id"]
        uid_emb = _query_sparse_lookup(self.user_id_table, uid_vals, uid_lens)
        results["click.query"] = jnp.concatenate(
            [uid_emb, dense_feature["user_age"]], axis=1)

        # ------------------ sequence part ------------------
        iid_vals, iid_lens = sparse_feature["click_item_id"]
        results["click.sequence_length"] = iid_lens

        if max_seq_length is None:
            # Fallback matching torch's _int_item(torch.max(lengths)): host sync and
            # a recompile per distinct length.  Prefer passing a static capacity.
            max_seq_length = int(jax.device_get(jnp.max(iid_lens)))

        price_vals, price_lens = sequence_dense_features["click_price"]
        results["click.sequence"] = _sequence_group_forward(
            self.item_id_table, iid_vals, iid_lens, price_vals, price_lens,
            max_seq_len=int(max_seq_length))
        return results


# ----------------------------------------------------------------------------
# Pure numpy reference for correctness check
# ----------------------------------------------------------------------------
def _np_pad_jagged(vals, lengths, L):
    B = len(lengths)
    D = vals.shape[1]
    out = np.zeros((B, L, D), vals.dtype)
    off = 0
    for b in range(B):
        n = int(lengths[b])
        take = min(n, L)
        out[b, :take] = vals[off:off + take]
        off += n
    return out


def _np_reference(mod, sparse, dense, seq_dense, L):
    uid_vals, uid_lens = (np.asarray(x) for x in sparse["user_id"])
    iid_vals, iid_lens = (np.asarray(x) for x in sparse["click_item_id"])
    price_vals, price_lens = (np.asarray(x) for x in seq_dense["click_price"])
    u_tab = np.asarray(mod.user_id_table)
    i_tab = np.asarray(mod.item_id_table)

    uid_emb_jag = u_tab[uid_vals]
    uid_q = _np_pad_jagged(uid_emb_jag, uid_lens, 1)[:, 0, :]
    query = np.concatenate([uid_q, np.asarray(dense["user_age"])], axis=1)

    iid_seq = _np_pad_jagged(i_tab[iid_vals], iid_lens, L)
    price_seq = _np_pad_jagged(price_vals, price_lens, L)
    seq = np.concatenate([iid_seq, price_seq], axis=2)
    return {"click.query": query,
            "click.sequence": seq,
            "click.sequence_length": iid_lens}


# ----------------------------------------------------------------------------
if __name__ == "__main__":
    key = jax.random.PRNGKey(0)
    k_mod, k1, k2, k3, k4 = jax.random.split(key, 5)

    mod = SequenceEmbeddingGroup(k_mod)

    B = 3
    # sparse query feature: one id per sample (lengths = 1)
    user_id_vals = jax.random.randint(k1, (B,), 0, 50, dtype=jnp.int32)
    user_id_lens = jnp.ones((B,), jnp.int32)
    # sparse sequence feature: jagged ids
    item_lens_np = np.array([2, 4, 1], np.int32)
    item_lens = jnp.asarray(item_lens_np)
    item_total = int(item_lens_np.sum())
    item_vals = jax.random.randint(k2, (item_total,), 0, 100, dtype=jnp.int32)
    # dense query feature
    user_age = jax.random.normal(k3, (B, 8), jnp.float32)
    # dense sequence feature (jagged values, dim 16)
    price_lens_np = np.array([2, 4, 1], np.int32)
    price_lens = jnp.asarray(price_lens_np)
    price_total = int(price_lens_np.sum())
    price_vals = jax.random.normal(k4, (price_total, 16), jnp.float32)

    sparse_feature = {
        "user_id": (user_id_vals, user_id_lens),
        "click_item_id": (item_vals, item_lens),
    }
    dense_feature = {"user_age": user_age}
    sequence_dense_features = {"click_price": (price_vals, price_lens)}

    # Static group sequence length (known at the data-pipeline level); avoids the
    # mid-forward device_get host sync and per-length recompiles.
    L_static = int(item_lens_np.max())

    out = mod.forward(sparse_feature, dense_feature, sequence_dense_features,
                      max_seq_length=L_static)
    out = jax.block_until_ready(out)

    ref = _np_reference(mod, sparse_feature, dense_feature,
                        sequence_dense_features, L_static)

    assert out["click.query"].shape == (B, 40)
    assert out["click.sequence"].shape == (B, L_static, 48)
    np.testing.assert_allclose(np.asarray(out["click.query"]),
                               ref["click.query"], atol=1e-5, rtol=1e-5)
    np.testing.assert_allclose(np.asarray(out["click.sequence"]),
                               ref["click.sequence"], atol=1e-5, rtol=1e-5)
    np.testing.assert_array_equal(np.asarray(out["click.sequence_length"]),
                                  ref["click.sequence_length"])

    print("KERNEL_OK")
</pallas_src>

<mosaic_0001>
module attributes {stable_mosaic.version = 11 : i64} {
  func.func @_fused_seq_kernel(%arg0: i32, %arg1: memref<8x2xi32, #tpu.memory_space<vmem>>, %arg2: memref<256x48xf32, #tpu.memory_space<vmem>>, %arg3: memref<8x48xf32, #tpu.memory_space<vmem>>) attributes {dimension_semantics = [#tpu.dimension_semantics<parallel>], iteration_bounds = array<i64: 2>, scalar_prefetch = 0 : i64, scratch_operands = 0 : i64, tpu.core_type = #tpu.core_type<tc>, window_params = [{transform_indices = @transform_0, window_bounds = array<i64: 8, 2>}, {pipeline_mode = #tpu.pipeline_mode<synchronous>, transform_indices = @transform_1, window_bounds = array<i64: 256, 48>}, {transform_indices = @transform_2, window_bounds = array<i64: 8, 48>}]} {
    %c0 = arith.constant 0 : index
    %c0_0 = arith.constant 0 : index
    %0 = vector.load %arg1[%c0, %c0_0] : memref<8x2xi32, #tpu.memory_space<vmem>>, vector<8x2xi32>
    %1 = vector.extract_strided_slice %0 {offsets = [0, 0], sizes = [8, 1], strides = [1, 1]} : vector<8x2xi32> to vector<8x1xi32>
    %2 = vector.extract_strided_slice %0 {offsets = [0, 1], sizes = [8, 1], strides = [1, 1]} : vector<8x2xi32> to vector<8x1xi32>
    %3 = tpu.iota {dimensions = array<i32: 1>} : vector<8x256xi32>
    %4 = vector.broadcast %1 : vector<8x1xi32> to vector<8x256xi32>
    %5 = arith.cmpi eq, %3, %4 : vector<8x256xi32>
    %6 = vector.broadcast %2 : vector<8x1xi32> to vector<8x256xi32>
    %7 = arith.cmpi eq, %3, %6 : vector<8x256xi32>
    %8 = arith.ori %5, %7 : vector<8x256xi1>
    %9 = arith.extui %8 : vector<8x256xi1> to vector<8x256xi32>
    %10 = arith.sitofp %9 : vector<8x256xi32> to vector<8x256xf32>
    %c0_1 = arith.constant 0 : index
    %c0_2 = arith.constant 0 : index
    %11 = vector.load %arg2[%c0_1, %c0_2] : memref<256x48xf32, #tpu.memory_space<vmem>>, vector<256x48xf32>
    %cst = arith.constant dense<0.000000e+00> : vector<8x48xf32>
    %12 = tpu.matmul %10, %11, %cst {dimension_numbers = #tpu.dot_dimension_numbers<[1], [0], [0], [1], [0, 0, 1, 1], [], []>} : vector<8x256xf32>, vector<256x48xf32>, vector<8x48xf32> -> vector<8x48xf32>
    %c0_3 = arith.constant 0 : index
    %c0_4 = arith.constant 0 : index
    %13 = vector.load %arg3[%c0_3, %c0_4] : memref<8x48xf32, #tpu.memory_space<vmem>>, vector<8x48xf32>
    tpu.vector_store %arg3[%c0_3, %c0_4], %12 {strides = array<i32>} : memref<8x48xf32, #tpu.memory_space<vmem>>, vector<8x48xf32>,
    return
  }
  func.func @transform_0(%arg0: i32) -> (i32, i32) {
    %c0_i32 = arith.constant 0 : i32
    %c0_i32_0 = arith.constant 0 : i32
    return %arg0, %c0_i32 : i32, i32
  }
  func.func @transform_1(%arg0: i32) -> (i32, i32) {
    %c0_i32 = arith.constant 0 : i32
    %c0_i32_0 = arith.constant 0 : i32
    %c0_i32_1 = arith.constant 0 : i32
    return %c0_i32, %c0_i32_0 : i32, i32
  }
  func.func @transform_2(%arg0: i32) -> (i32, i32) {
    %c0_i32 = arith.constant 0 : i32
    %c0_i32_0 = arith.constant 0 : i32
    return %arg0, %c0_i32 : i32, i32
  }
}

</mosaic_0001>

<bundles_post_ra>
// kernel: _sequence_group_forward.1
= control target key start
LH: loop header
LB: loop body
LE: loop exit
PB: predicated region body
PF: predicated region fallthrough
CT: control target
= control target key end

     0   :  { %s403_s9 = smov 0   ;;  %s523_s0 = inlined_call_operand.vmem [shape: s32[16,2], index: 0, kind: input, shape index: {}]   ;;  %s524_s1 = inlined_call_operand.vmem [shape: f32[256,48], index: 1, kind: input, shape index: {}]   ;;  %s525_s2 = inlined_call_operand.vmem [shape: f32[16,48], index: 2, kind: output, shape index: {}]  }
   0x1 LB: > { %s316_s10 = sadd.s32 4294967295, %s383_s9   ;;  %p320_p0 = scmp.ge.s32.totalorder %s383_s9, 1  ;;  %s383_s9 = sphi %s403_s9, %s12_s9  }
   0x2   : > { %p111_p1 = scmp.lt.s32.totalorder %s383_s9, 3 }
   0x4   : > { %p112_p2 = pnand %p320_p0, %p111_p1 }
   0x5   : > { %p131_p3 = scmp.lt.s32.totalorder (!%p112_p2), %s316_s10, 1 }
   0x6   : > { %115 = sbr.rel (%p112_p2) target bundleno = 347 (0x15b), region = 28 }
   0xb   : > { %v190_v0 = vld [vmem:[%s524_s1 + $0xf8] sm:$0xff]  ;;  %v189_v2 = vld [vmem:[%s524_s1 + $0xf0] sm:$0xff]  ;;  %v385_v3 = vmov 0   ;;  %s527_s10 = smov (!%p131_p3, %s316_s10), 1  ;;  %v188_v5 = vld [vmem:[%s524_s1 + $0xe8] sm:$0xff]  ;;  %v386_v15 = vmov 1   ;;  %v140_v35 = vlaneseq }
   0xc   : > { %v174_v1 = vld [vmem:[%s524_s1 + $0x78] sm:$0xff]  ;;  %375 = vset.pattern.permute.xlu0 %v385_v3  ;;  %329 = vmatprep.subr.mxu0 %v190_v0  ;;  %v173_v4 = vld [vmem:[%s524_s1 + $0x70] sm:$0xff]  ;;  %v172_v6 = vld [vmem:[%s524_s1 + $0x68] sm:$0xff]  ;;  %s321_s23 = sshll.u32 %s527_s10, 3  ;;  %v387_v40 = vmov 1.0   ;;  %vm261_vm6 = vcmask 392192  }
   0xd   : > { %330 = vmatpush3.msra.mxu0 %v174_v1  ;;  %v187_v7 = vld [vmem:[%s524_s1 + $0xe0] sm:$0xff]  ;;  %s134_s28 = scalar_lea.vmem %s523_s0, %s321_s23  ;;  %v186_v10 = vld [vmem:[%s524_s1 + $0xd8] sm:$0xff]  ;;  %v185_v12 = vld [vmem:[%s524_s1 + $0xd0] sm:$0xff]  ;;  %v141_v36 = vand.u32 127, %v140_v35  ;;  %s138_s3 = scalar_lea.vmem %s525_s2, %s321_s23 }
   0xe   : > { %331 = vmatprep.subr.mxu0 %v189_v2  ;;  %v171_v8 = vld [vmem:[%s524_s1 + $0x60] sm:$0xff]  ;;  %v170_v11 = vld [vmem:[%s524_s1 + $0x58] sm:$0xff]  ;;  %v169_v13 = vld [vmem:[%s524_s1 + $0x50] sm:$0xff] }
   0xf   : > { %332 = vmatpush3.msra.mxu0 %v173_v4  ;;  %v139_v9 = vld [vmem:[%s134_s28] sm:$0xff]  ;;  %v184_v14 = vld [vmem:[%s524_s1 + $0xc8] sm:$0xff]  ;;  %v182_v19 = vld [vmem:[%s524_s1 + $0xb8] sm:$0xff]  ;;  %v142_v38 = vadd.s32 128, %v141_v36 }
  0x10   : > { %333 = vmatprep.subr.mxu0 %v188_v5  ;;  %144 = vperm.xlu0 %375, %v139_v9   ;;  %v168_v16 = vld [vmem:[%s524_s1 + $0x48] sm:$0xff]  ;;  %v183_v17 = vld [vmem:[%s524_s1 + $0xc0] sm:$0xff]  ;;  %v166_v20 = vld [vmem:[%s524_s1 + $0x38] sm:$0xff] }
  0x11   : > { %334 = vmatpush3.msra.mxu0 %v172_v6  ;;  %v167_v18 = vld [vmem:[%s524_s1 + $0x40] sm:$0xff]  ;;  %v181_v21 = vld [vmem:[%s524_s1 + $0xb0] sm:$0xff]  ;;  %v180_v23 = vld [vmem:[%s524_s1 + $0xa8] sm:$0xff] }
  0x12   : > { %335 = vmatprep.subr.mxu0 %v187_v7  ;;  %v165_v22 = vld [vmem:[%s524_s1 + $0x30] sm:$0xff]  ;;  %v164_v24 = vld [vmem:[%s524_s1 + $0x28] sm:$0xff]  ;;  %v179_v25 = vld [vmem:[%s524_s1 + $0xa0] sm:$0xff] }
  0x13   : > { %336 = vmatpush3.msra.mxu0 %v171_v8  ;;  %v163_v26 = vld [vmem:[%s524_s1 + $0x20] sm:$0xff]  ;;  %v178_v27 = vld [vmem:[%s524_s1 + $0x98] sm:$0xff]  ;;  %v177_v29 = vld [vmem:[%s524_s1 + $0x90] sm:$0xff] }
  0x14   : > { %337 = vmatprep.subr.mxu0 %v186_v10  ;;  %376 = vset.pattern.permute.xlu0 %v386_v15  ;;  %v162_v28 = vld [vmem:[%s524_s1 + $0x18] sm:$0xff]  ;;  %v161_v30 = vld [vmem:[%s524_s1 + $0x10] sm:$0xff]  ;;  %v176_v31 = vld [vmem:[%s524_s1 + $0x88] sm:$0xff] }
  0x15   : > { %338 = vmatpush3.msra.mxu0 %v170_v11  ;;  %149 = vperm.xlu0 %376, %v139_v9   ;;  %v160_v32 = vld [vmem:[%s524_s1 + $0x8] sm:$0xff]  ;;  %v175_v33 = vld [vmem:[%s524_s1 + $0x80] sm:$0xff] }
  0x16   : > { %339 = vmatprep.subr.mxu0 %v185_v12  ;;  %v159_v34 = vld [vmem:[%s524_s1] sm:$0xff] }
  0x17   : > { %340 = vmatpush3.msra.mxu0 %v169_v13 }
  0x18   : > { %341 = vmatprep.subr.mxu0 %v184_v14 }
  0x19   : > { %342 = vmatpush3.msra.mxu0 %v168_v16 }
  0x1a   : > { %343 = vmatprep.subr.mxu0 %v183_v17 }
  0x1b   : > { %344 = vmatpush3.msra.mxu0 %v167_v18 }
  0x1c   : > { %345 = vmatprep.subr.mxu0 %v182_v19 }
  0x1d   : > { %346 = vmatpush3.msra.mxu0 %v166_v20 }
  0x1e   : > { %347 = vmatprep.subr.mxu0 %v181_v21 }
  0x1f   : > { %348 = vmatpush3.msra.mxu0 %v165_v22 }
  0x20   : > { %349 = vmatprep.subr.mxu0 %v180_v23 }
  0x21   : > { %350 = vmatpush3.msra.mxu0 %v164_v24 }
  0x22   : > { %351 = vmatprep.subr.mxu0 %v179_v25 }
  0x23   : > { %352 = vmatpush3.msra.mxu0 %v163_v26 }
  0x24   : > { %353 = vmatprep.subr.mxu0 %v178_v27 }
  0x25   : > { %354 = vmatpush3.msra.mxu0 %v162_v28 }
  0x26   : > { %355 = vmatprep.subr.mxu0 %v177_v29 }
  0x27   : > { %356 = vmatpush3.msra.mxu0 %v161_v30 }
  0x28   : > { %357 = vmatprep.subr.mxu0 %v176_v31 }
  0x29   : > { %358 = vmatpush3.msra.mxu0 %v160_v32 }
  0x2a   : > { %359 = vmatprep.subr.mxu0 %v175_v33 }
  0x2b   : > { %360 = vmatpush3.msra.mxu0 %v159_v34 }
  0x8b   : > { %v145_v37 = vpop.permute.xlu0 %144 }
  0x8c   : > { %vm146_vm0 = vcmp.eq.s32.totalorder %v141_v36, %v145_v37  ;;  %vm147_vm4 = vcmp.eq.s32.totalorder %v142_v38, %v145_v37 }
  0x90   : > { %v150_v39 = vpop.permute.xlu0 %149 }
  0x91   : > { %vm151_vm1 = vcmp.eq.s32.totalorder %v141_v36, %v150_v39  ;;  %vm152_vm2 = vcmp.eq.s32.totalorder %v142_v38, %v150_v39 }
  0x92   : > { %vm153_vm3 = vmor %vm146_vm0, %vm151_vm1 }
  0x93   : > { %vm154_vm5 = vmor %vm147_vm4, %vm152_vm2 }
  0x94   : > { %325 = vmatprep.mubr.msk.f32.mxu0 %vm154_vm5, %v387_v40 }
  0x95   : > { %326 = vmatmul.mubr.msk.f32.vlgmr.msra.gmra.mxu0 %vm153_vm3, %v387_v40 }
 0x155   : > { %v361_v41 = vpop.f32.mrf.mxu0 }
 0x157   : > { %v362_v42 = vpop.f32.mrf.mxu0 }
 0x158   : > { %v363_v43 = vadd.f32 %v362_v42, %v361_v41 }
 0x15a   : > { %262 = vst.msk [vmem:[%s138_s3] sm:$0xff] %vm261_vm6, %v363_v43 }
 0x15b PF: > { %s12_s9 = sadd.s32 1, %s383_s9  }
 0x15c   : > { %p9_p4 = scmp.ge.s32.totalorder %s12_s9, 4  }
 0x15e   :  { %11 = sbr.rel (!%p9_p4) target bundleno = 1 (0x1), region = 58 }

</bundles_post_ra>
